<compile_context>
chip_gen: v5e
topology: v5e:2x2
jax: 0.10.0
libtpu: 0.0.40
codegen_flags: <defaults>
</compile_context>

<pallas_src>
import jax
import jax.numpy as jnp
from jax.experimental import pallas as pl
from jax.experimental.pallas import tpu as pltpu

KSIZE = 7
PAD = 3  # 'same' padding for kernel_size == 7


def _spatial_attention_kernel(x_ref, band_avg_ref, band_max_ref, o_ref):
    """One grid step: a lane-dense (Bt, C, H*W) slab of images."""
    x = x_ref[...]                                           # (Bt, C, HW), input dtype

    # Channel-wise mean (f32 accumulation) and max (native dtype) -> (Bt, HW).
    avg = jnp.mean(x, axis=1, dtype=jnp.float32)
    mx = jnp.max(x, axis=1)

    # 7x7 conv over the 2-channel (avg, max) map as two MXU matmuls against
    # the precomputed banded weight matrices (zero padding folded in).
    # bf16 operands -> full MXU rate; f32 accumulation.
    acc = jnp.dot(avg.astype(jnp.bfloat16), band_avg_ref[...],
                  preferred_element_type=jnp.float32)        # (Bt, HW)
    acc = acc + jnp.dot(mx.astype(jnp.bfloat16), band_max_ref[...],
                        preferred_element_type=jnp.float32)

    att = jax.nn.sigmoid(acc)                                # EUP path, stable

    # Broadcast multiply + store stay on the lane-dense (Bt, C, HW) slab.
    o_ref[...] = (x * att[:, None, :].astype(x.dtype)).astype(o_ref.dtype)


def _conv_band_matrices(weight, H, W, band_dtype=jnp.bfloat16):
    """Fold the 2->1 channel 7x7 'same' conv into two (H*W, H*W) matrices.

    out_flat = avg_flat @ band_avg + max_flat @ band_max reproduces
    conv2d(concat([avg, max], ch=1), weight, padding=3, bias=None) exactly
    (up to the band dtype): band_ch[r*W+c, y*W+x] = w[ch, r-y+3, c-x+3]
    inside the 7x7 window and 0 outside (which also implements the zero
    padding).
    """
    w = weight.reshape(2, KSIZE, KSIZE).astype(jnp.float32)   # (2, 7, 7)
    HW = H * W
    idx = jnp.arange(HW)
    r = idx // W                                              # map row
    c = idx % W                                               # map column
    dy = r[:, None] - r[None, :] + PAD                        # (HW, HW)
    dx = c[:, None] - c[None, :] + PAD
    valid = (dy >= 0) & (dy < KSIZE) & (dx >= 0) & (dx < KSIZE)
    dyc = jnp.clip(dy, 0, KSIZE - 1)
    dxc = jnp.clip(dx, 0, KSIZE - 1)
    band_avg = jnp.where(valid, w[0][dyc, dxc], 0.0).astype(band_dtype)
    band_max = jnp.where(valid, w[1][dyc, dxc], 0.0).astype(band_dtype)
    return band_avg, band_max                                 # 2 x (HW, HW)


def _choose_batch_tile(B, C, HW, itemsize):
    bytes_per_img = max(1, C * HW * itemsize)
    # ~2 MiB payload per grid step: measured tiled-copy data is ~85% of HBM
    # roofline at ~1 MiB blocks and ~86%+ beyond, and fewer steps amortize
    # the ~0.35us/step pipeline overhead (matters most on v6e).
    target_imgs = max(1, (2 << 20) // bytes_per_img)
    # VMEM cap: the x block is double-buffered as BOTH input and output
    # (4x block bytes) on top of the bf16 bands and small f32 temporaries.
    # A ~3 MiB block keeps that well inside v7x's 32 MiB default scoped
    # VMEM (64 MiB physical); v5e/v6e have 128 MiB so this never binds there.
    cap_imgs = max(1, (3 << 20) // bytes_per_img)
    bt = min(B, target_imgs, cap_imgs)
    # v7x has 2 TensorCores and the grid axis is "parallel": never collapse
    # to a single grid step when B >= 2, so both cores get work.  On
    # single-core v5e/v6e the extra step costs ~0.35us -- noise.
    if B >= 2:
        bt = min(bt, B // 2)
    bt = max(bt, 1)
    # Remainder-safe tiling: take the largest divisor of B within budget so
    # every block is full and every store exact.  (For awkward/prime B a
    # masked pl.cdiv tail would avoid degrading toward Bt=1; not needed for
    # the shapes exercised here.)
    while B % bt:
        bt -= 1
    return bt


def spatial_attention(x, weight, *, batch_tile=None):
    """x: (B, C, H, W); weight: (1, 2, 7, 7) conv filter (no bias)."""
    B, C, H, W = x.shape
    HW = H * W

    # Lane-dense view: H*W on the last (lane) dimension.
    # Sublane note: the (Bt, C, HW) block pads C up to the sublane count
    # (8 f32 / 16 bf16); tiny C (like the demo's C=4) wastes part of each
    # vreg on the broadcast multiply.  Real CBAM channel counts (>=64) are
    # already aligned, so this is a small-shape caveat only.
    x_flat = x.reshape(B, C, HW)
    band_avg, band_max = _conv_band_matrices(weight, H, W)    # 2 x (HW, HW) bf16

    if batch_tile is not None:
        if B % batch_tile != 0:
            raise ValueError(
                f"batch_tile={batch_tile} must divide B={B}; otherwise the "
                f"last {B % batch_tile} images would be left unwritten.")
        Bt = batch_tile
    else:
        Bt = _choose_batch_tile(B, C, HW, x.dtype.itemsize)
    grid = (B // Bt,)

    out_flat = pl.pallas_call(
        _spatial_attention_kernel,
        out_shape=jax.ShapeDtypeStruct((B, C, HW), x.dtype),
        grid=grid,
        in_specs=[
            pl.BlockSpec((Bt, C, HW), lambda b: (b, 0, 0)),   # image slab
            pl.BlockSpec((HW, HW), lambda b: (0, 0)),         # avg conv band
            pl.BlockSpec((HW, HW), lambda b: (0, 0)),         # max conv band
        ],
        out_specs=pl.BlockSpec((Bt, C, HW), lambda b: (b, 0, 0)),
        compiler_params=pltpu.CompilerParams(
            dimension_semantics=("parallel",)),               # megacore-shardable
    )(x_flat, band_avg, band_max)

    return out_flat.reshape(B, C, H, W)


def _reference(x, weight):
    """Pure-JAX (all-f32) reference mirroring the PyTorch forward."""
    avg_out = jnp.mean(x, axis=1, keepdims=True)
    max_out = jnp.max(x, axis=1, keepdims=True)
    x1 = jnp.concatenate([avg_out, max_out], axis=1)          # (B, 2, H, W)
    conv = jax.lax.conv_general_dilated(
        x1.astype(jnp.float32), weight.astype(jnp.float32),
        window_strides=(1, 1), padding=((PAD, PAD), (PAD, PAD)),
        dimension_numbers=("NCHW", "OIHW", "NCHW"))
    att = jax.nn.sigmoid(conv)
    return x * att


if __name__ == "__main__":
    key = jax.random.PRNGKey(0)
    kx, kw = jax.random.split(key)

    B, C, H, W = 2, 4, 16, 16
    x = jax.random.normal(kx, (B, C, H, W), dtype=jnp.float32)

    # Deterministic conv weight init (PyTorch-style uniform bound 1/sqrt(fan_in)).
    fan_in = 2 * KSIZE * KSIZE
    bound = 1.0 / jnp.sqrt(jnp.float32(fan_in))
    weight = jax.random.uniform(kw, (1, 2, KSIZE, KSIZE),
                                minval=-bound, maxval=bound, dtype=jnp.float32)

    out = jax.block_until_ready(spatial_attention(x, weight))

    ref = _reference(x, weight)
    assert out.shape == (B, C, H, W)
    # Tolerance accounts for the bf16 MXU matmul operands (band + pooled
    # maps); observed error on the final output is O(1e-3) or less since the
    # sigmoid compresses the conv-output delta.
    assert jnp.allclose(out, ref, atol=7.5e-3, rtol=7.5e-3), "mismatch vs reference"

    print("KERNEL_OK")
</pallas_src>

<mosaic_0001>
module attributes {stable_mosaic.version = 11 : i64} {
  func.func @_spatial_attention_kernel(%arg0: i32, %arg1: memref<1x4x256xf32, #tpu.memory_space<vmem>>, %arg2: memref<256x256xbf16, #tpu.memory_space<vmem>>, %arg3: memref<256x256xbf16, #tpu.memory_space<vmem>>, %arg4: memref<1x4x256xf32, #tpu.memory_space<vmem>>) attributes {dimension_semantics = [#tpu.dimension_semantics<parallel>], iteration_bounds = array<i64: 2>, scalar_prefetch = 0 : i64, scratch_operands = 0 : i64, tpu.core_type = #tpu.core_type<tc>, window_params = [{transform_indices = @transform_0, window_bounds = array<i64: 1, 4, 256>}, {pipeline_mode = #tpu.pipeline_mode<synchronous>, transform_indices = @transform_1, window_bounds = array<i64: 256, 256>}, {pipeline_mode = #tpu.pipeline_mode<synchronous>, transform_indices = @transform_2, window_bounds = array<i64: 256, 256>}, {transform_indices = @transform_3, window_bounds = array<i64: 1, 4, 256>}]} {
    %c0 = arith.constant 0 : index
    %c0_0 = arith.constant 0 : index
    %c0_1 = arith.constant 0 : index
    %0 = vector.load %arg1[%c0, %c0_0, %c0_1] : memref<1x4x256xf32, #tpu.memory_space<vmem>>, vector<1x4x256xf32>
    %cst = arith.constant dense<0.000000e+00> : vector<1x256xf32>
    %1 = vector.multi_reduction <add>, %0, %cst [1] : vector<1x4x256xf32> to vector<1x256xf32>
    %cst_2 = arith.constant 4.000000e+00 : f32
    %2 = vector.broadcast %cst_2 : f32 to vector<1x256xf32>
    %3 = arith.divf %1, %2 : vector<1x256xf32>
    %cst_3 = arith.constant dense<0xFF800000> : vector<1x256xf32>
    %4 = vector.multi_reduction <maximumf>, %0, %cst_3 [1] : vector<1x4x256xf32> to vector<1x256xf32>
    %5 = arith.truncf %3 : vector<1x256xf32> to vector<1x256xbf16>
    %c0_4 = arith.constant 0 : index
    %c0_5 = arith.constant 0 : index
    %6 = vector.load %arg2[%c0_4, %c0_5] : memref<256x256xbf16, #tpu.memory_space<vmem>>, vector<256x256xbf16>
    %cst_6 = arith.constant dense<0.000000e+00> : vector<1x256xf32>
    %7 = tpu.matmul %5, %6, %cst_6 {dimension_numbers = #tpu.dot_dimension_numbers<[1], [0], [0], [1], [0, 0, 1, 1], [], []>} : vector<1x256xbf16>, vector<256x256xbf16>, vector<1x256xf32> -> vector<1x256xf32>
    %8 = arith.truncf %4 : vector<1x256xf32> to vector<1x256xbf16>
    %c0_7 = arith.constant 0 : index
    %c0_8 = arith.constant 0 : index
    %9 = vector.load %arg3[%c0_7, %c0_8] : memref<256x256xbf16, #tpu.memory_space<vmem>>, vector<256x256xbf16>
    %cst_9 = arith.constant dense<0.000000e+00> : vector<1x256xf32>
    %10 = tpu.matmul %8, %9, %cst_9 {dimension_numbers = #tpu.dot_dimension_numbers<[1], [0], [0], [1], [0, 0, 1, 1], [], []>} : vector<1x256xbf16>, vector<256x256xbf16>, vector<1x256xf32> -> vector<1x256xf32>
    %11 = arith.addf %7, %10 : vector<1x256xf32>
    %12 = arith.negf %11 : vector<1x256xf32>
    %13 = math.exp %12 : vector<1x256xf32>
    %cst_10 = arith.constant 1.000000e+00 : f32
    %14 = vector.broadcast %cst_10 : f32 to vector<1x256xf32>
    %15 = arith.addf %14, %13 : vector<1x256xf32>
    %16 = arith.divf %14, %15 : vector<1x256xf32>
    %17 = vector.shape_cast %16 : vector<1x256xf32> to vector<1x1x256xf32>
    %18 = vector.broadcast %17 : vector<1x1x256xf32> to vector<1x4x256xf32>
    %19 = arith.mulf %0, %18 : vector<1x4x256xf32>
    %c0_11 = arith.constant 0 : index
    %c0_12 = arith.constant 0 : index
    %c0_13 = arith.constant 0 : index
    %20 = vector.load %arg4[%c0_11, %c0_12, %c0_13] : memref<1x4x256xf32, #tpu.memory_space<vmem>>, vector<1x4x256xf32>
    tpu.vector_store %arg4[%c0_11, %c0_12, %c0_13], %19 {strides = array<i32>} : memref<1x4x256xf32, #tpu.memory_space<vmem>>, vector<1x4x256xf32>,
    return
  }
  func.func @transform_0(%arg0: i32) -> (i32, i32, i32) {
    %c0_i32 = arith.constant 0 : i32
    %c0_i32_0 = arith.constant 0 : i32
    %c0_i32_1 = arith.constant 0 : i32
    return %arg0, %c0_i32, %c0_i32_0 : i32, i32, i32
  }
  func.func @transform_1(%arg0: i32) -> (i32, i32) {
    %c0_i32 = arith.constant 0 : i32
    %c0_i32_0 = arith.constant 0 : i32
    %c0_i32_1 = arith.constant 0 : i32
    return %c0_i32, %c0_i32_0 : i32, i32
  }
  func.func @transform_2(%arg0: i32) -> (i32, i32) {
    %c0_i32 = arith.constant 0 : i32
    %c0_i32_0 = arith.constant 0 : i32
    %c0_i32_1 = arith.constant 0 : i32
    return %c0_i32, %c0_i32_0 : i32, i32
  }
  func.func @transform_3(%arg0: i32) -> (i32, i32, i32) {
    %c0_i32 = arith.constant 0 : i32
    %c0_i32_0 = arith.constant 0 : i32
    %c0_i32_1 = arith.constant 0 : i32
    return %arg0, %c0_i32, %c0_i32_0 : i32, i32, i32
  }
}

</mosaic_0001>

<bundles_post_ra>
// kernel: tpu_custom_call.1
= control target key start
LH: loop header
LB: loop body
LE: loop exit
PB: predicated region body
PF: predicated region fallthrough
CT: control target
= control target key end

     0   :  { %8 = vsyncpa [#allocation3], 0  ;;  %s1691_s0 = inlined_call_operand.hbm [shape: f32[2,4,256], index: 0, kind: input, shape index: {}]   ;;  %s1692_s1 = inlined_call_operand.hbm [shape: bf16[256,256], index: 1, kind: input, shape index: {}]   ;;  %s1693_s2 = inlined_call_operand.hbm [shape: bf16[256,256], index: 2, kind: input, shape index: {}]   ;;  %s1694_s3 = inlined_call_operand.hbm [shape: f32[2,4,256], index: 3, kind: output, shape index: {}]  }
   0x1   :  { %10 = vsyncpa [#allocation3 + $0x1], 0 }
   0x2   :  { %11 = vsyncpa [#allocation6], 0 }
   0x3   :  { %12 = vsyncpa [#allocation4], 0 }
   0x4   :  { %14 = vsyncpa [#allocation4 + $0x1], 0  ;;  %s1526_s12 = smov 0   ;;  %s1528_s13 = smov 0  }
   0x5   :  { %s1530_s14 = smov 0   ;;  %s1532_s15 = smov 0  }
   0x6 LB: > { %s130_s18 = sshll.u32 %s1692_s1, 4  ;;  %s1550_s19 = sadd.s32 4294967295, %s1499_s15   ;;  %s1499_s15 = sphi %s1532_s15, %s1705_s15   ;;  %s1495_s14 = sphi %s1530_s14, %s1704_s14   ;;  %s1491_s13 = sphi %s1528_s13, %s1703_s13   ;;  %s1487_s12 = sphi %s1526_s12, %s1702_s12   ;;  %s131_s18 = int_to_ptr.hbm [resolvable:$true] %s130_s18 }
   0x7   : > { %p918_p0 = scmp.ge.s32.totalorder %s1499_s15, 1  ;;  %p41_p1 = scmp.eq.s32.totalorder %s1550_s19, 0 }
   0x8   : > { %p119_p2 = scmp.lt.s32.totalorder %s1499_s15, 3  ;;  %s1501_s21 = smov [#allocation5]  }
   0x9   : > { %s132_s22 = sshll.u32 %s1501_s21, 4  ;;  %s144_s25 = sshll.u32 %s1693_s2, 4  ;;  %s133_s22 = int_to_ptr.vmem [resolvable:$true] %s132_s22  ;;  %s145_s25 = int_to_ptr.hbm [resolvable:$true] %s144_s25 }
   0xa   : > { %p1555_p3 = pnand %p918_p0, %p119_p2  ;;  %s1502_s26 = smov [#allocation7]  }
   0xb   : > { %s146_s27 = sshll.u32 %s1502_s26, 4  ;;  %s1503_s28 = smov 128   ;;  %s147_s27 = int_to_ptr.vmem [resolvable:$true] %s146_s27 }
   0xc   : > { %p1271_p4 = pneg %p1555_p3  ;;  %s1504_s29 = smov 8  }
   0xd   : > { %s917_s30 = sadd.s32 4294967294, %s1499_s15   ;;  %s1569_s4 = sadd.s32 1, %s1499_s15  }
   0xe   : > { %p1272_p6 = pnand %p1271_p4, %p41_p1  ;;  %s24_s5 = ssub.s32 %s1499_s15, %s1569_s4 }
   0xf   : > { %s27_s6 = sadd.s32 1, %s1495_s14  ;;  %p25_p7 = scmp.eq.s32.totalorder %s24_s5, 0 }
  0x10   : > { %1274 = dma.hbm_to_vmem [thread:$0]  (!%p1272_p6), %s131_s18, 4096, %s133_s22, [#allocation6], %s1503_s28, %s1503_s28, %s1504_s29  }
  0x11   : > { %1277 = dma.hbm_to_vmem [thread:$0]  (!%p1272_p6), %s145_s25, 4096, %s147_s27, [#allocation6], %s1503_s28, %s1503_s28, %s1504_s29  }
  0x12   : > { %p34_p8 = scmp.ne.s32.totalorder %s1495_s14, %s1491_s13  ;;  %p35_p9 = scmp.eq.s32.totalorder %s1499_s15, 0 }
  0x13   : > { %p40_p10 = scmp.ne.s32.totalorder %s1491_s13, %s1487_s12  ;;  %p106_p13 = scmp.eq.s32.totalorder %s1550_s19, 1 }
  0x14   : > { %s1580_s7 = scalar_select %p25_p7, %s1495_s14, %s27_s6  }
  0x15   : > { %p1582_p11 = por %p35_p9, %p34_p8  ;;  %p1588_p12 = por %p41_p1, %p40_p10 }
  0x16   : > { %p112_p0 = scmp.eq.s32.totalorder %s917_s30, 1  ;;  %p1288_p2 = scmp.lt.s32.totalorder %s1499_s15, 2 }
  0x17   : > { %s160_s10 = sand.u32 1, %s1495_s14   ;;  %p1595_p4 = por %p106_p13, %p34_p8 }
  0x18   : > { %p1599_p6 = por %p112_p0, %p40_p10  ;;  %s922_s17 = sshll.u32 %s160_s10, 3 }
  0x19   : > { %s1193_s18 = sshll.u32 %s1499_s15, 3  ;;  %s164_s24 = scalar_lea.vmem [#allocation2], %s922_s17 }
  0x1a   : > { %s169_s23 = scalar_lea.hbm %s1691_s0, %s1193_s18  ;;  %s173_s25 = sshll.u32 %s164_s24, 4  ;;  %s174_s25 = int_to_ptr.vmem [resolvable:$true] %s173_s25 }
  0x1b   : > { %s171_s26 = sshll.u32 %s169_s23, 4  ;;  %p1609_p7 = pnand %p1288_p2, %p1582_p11  ;;  %s172_s26 = int_to_ptr.hbm [resolvable:$true] %s171_s26 }
  0x1c   : > { %s161_s28 = scalar_lea.sflag [#allocation3], %s160_s10  ;;  %s1399_s29 = sshra.s32 %s172_s26, 4  ;;  %s1400_s29 = int_to_ptr.hbm [resolvable:$true] %s1399_s29 }
  0x1d   : > { %s1401_s30 = scalar_lea.hbm %s1400_s29, 8  ;;  %p1403_p9 = pneg %p1609_p7 }
  0x1e   : > { %p1402_p8 = scmp.ne.s32.totalorder %s1400_s29, %s1401_s30  ;;  %s1406_s17 = scalar_lea.hbm %s1691_s0, 16 }
  0x1f   : > { %p1407_p11 = scmp.lt.s32.totalorder %s1400_s29, %s1691_s0  ;;  %p1408_p0 = scmp.lt.s32.totalorder %s1406_s17, %s1401_s30 }
  0x20   : > { %p1404_p10 = pnand %p1403_p9, %p1402_p8 }
  0x21   : > { %p1409_p2 = por %p1408_p0, %p1407_p11 }
  0x22   : > { %p1405_p13 = pneg %p1404_p10 }
  0x24   : > { %p1410_p5 = pnand %p1409_p2, %p1405_p13 }
  0x26   : > { %1413 = shalt.err (!%p1410_p5)
}
  0x27   : > { %1281 = dma.hbm_to_vmem [thread:$0]  (!%p1609_p7), %s172_s26, 128, %s174_s25, %s161_s28  }
  0x28   : > { %182 = sbr.rel (%p1555_p3) target bundleno = 296 (0x128), region = 32  ;;  %s1626_s10 = sand.u32 (!%p1555_p3), 1, %s1491_s13  }
  0x29   : > { %s926_s21 = sshll.u32 (!%p1555_p3), %s1626_s10, 3  ;;  %s185_s22 = scalar_lea.sflag (!%p1555_p3), [#allocation3], %s1626_s10 }
  0x2a   : > { %s1632_s23 = scalar_lea.vmem (!%p1555_p3), [#allocation2], %s926_s21 }
  0x2d   : > { %1474 = dma.done.wait (%p1588_p12), %s185_s22, 128  }
  0x2e   : > { %1476 = vsyncadd (%p1588_p12), %s185_s22, 4294967168 }
  0x2f   : > { %1478 = dma.done.wait (%p41_p1), [#allocation6], 8192  }
  0x30   : > { %1480 = vsyncadd (%p41_p1), [#allocation6], 4294959104  ;;  %v988_v0 = vld [vmem:[#allocation7 + $0x70] sm:$0xf]  ;;  %v1241_v1 = vld [vmem:[#allocation7 + $0x74] sm:$0xf0] }
  0x31   : > { %v1240_v2 = vld [vmem:[#allocation7 + $0x74] sm:$0xf]  ;;  %v989_v3 = vor.u32 %v1241_v1, %v988_v0  ;;  %v990_v4 = vld [vmem:[#allocation7 + $0x78] sm:$0xf0]  ;;  %v1052_v9 = vld [vmem:[#allocation7 + $0xf0] sm:$0xf] }
  0x32   : > { %v1256_v5 = vld [vmem:[#allocation7 + $0xf4] sm:$0xf]  ;;  %v1054_v6 = vld [vmem:[#allocation7 + $0xf8] sm:$0xf0]  ;;  %v993_v7 = vor.u32 %v1240_v2, %v990_v4  ;;  %v1257_v10 = vld [vmem:[#allocation7 + $0xf4] sm:$0xf0] }
  0x33   : > { %v1057_v8 = vor.u32 %v1256_v5, %v1054_v6  ;;  %v980_v11 = vld [vmem:[#allocation7 + $0x60] sm:$0xf]  ;;  %500 = vmatpush.bf16.msra.mxu0 %v989_v3  ;;  %v1053_v12 = vor.u32 %v1257_v10, %v1052_v9  ;;  %v1239_v13 = vld [vmem:[#allocation7 + $0x64] sm:$0xf0]  ;;  %v1238_v14 = vld [vmem:[#allocation7 + $0x64] sm:$0xf] }
  0x34   : > { %v982_v15 = vld [vmem:[#allocation7 + $0x68] sm:$0xf0]  ;;  %526 = vmatpush.bf16.msra.mxu2 %v993_v7  ;;  %v981_v16 = vor.u32 %v1239_v13, %v980_v11  ;;  %v1254_v18 = vld [vmem:[#allocation7 + $0xe4] sm:$0xf]  ;;  %v1044_v20 = vld [vmem:[#allocation7 + $0xe0] sm:$0xf] }
  0x35   : > { %539 = vmatpush.bf16.msra.mxu3 %v1057_v8  ;;  %v985_v17 = vor.u32 %v1238_v14, %v982_v15  ;;  %v1046_v19 = vld [vmem:[#allocation7 + $0xe8] sm:$0xf0]  ;;  %513 = vmatpush.bf16.msra.mxu1 %v1053_v12  ;;  %v1255_v22 = vld [vmem:[#allocation7 + $0xe4] sm:$0xf0]  ;;  %v972_v23 = vld [vmem:[#allocation7 + $0x50] sm:$0xf] }
  0x36   : > { %v1049_v21 = vor.u32 %v1254_v18, %v1046_v19  ;;  %v1237_v24 = vld [vmem:[#allocation7 + $0x54] sm:$0xf0]  ;;  %v1045_v25 = vor.u32 %v1255_v22, %v1044_v20  ;;  %v1236_v26 = vld [vmem:[#allocation7 + $0x54] sm:$0xf]  ;;  %v974_v27 = vld [vmem:[#allocation7 + $0x58] sm:$0xf0] }
  0x37   : > { %v1252_v28 = vld [vmem:[#allocation7 + $0xd4] sm:$0xf]  ;;  %501 = vmatpush.bf16.msra.mxu0 %v981_v16  ;;  %v973_v29 = vor.u32 %v1237_v24, %v972_v23  ;;  %v1038_v30 = vld [vmem:[#allocation7 + $0xd8] sm:$0xf0]  ;;  %v1036_v31 = vld [vmem:[#allocation7 + $0xd0] sm:$0xf]  ;;  %v977_v33 = vor.u32 %v1236_v26, %v974_v27 }
  0x38   : > { %v1253_v32 = vld [vmem:[#allocation7 + $0xd4] sm:$0xf0]  ;;  %527 = vmatpush.bf16.msra.mxu2 %v985_v17  ;;  %v1041_v34 = vor.u32 %v1252_v28, %v1038_v30  ;;  %v964_v35 = vld [vmem:[#allocation7 + $0x40] sm:$0xf]  ;;  %v1235_v36 = vld [vmem:[#allocation7 + $0x44] sm:$0xf0] }
  0x39   : > { %540 = vmatpush.bf16.msra.mxu3 %v1049_v21  ;;  %v1234_v37 = vld [vmem:[#allocation7 + $0x44] sm:$0xf]  ;;  %514 = vmatpush.bf16.msra.mxu1 %v1045_v25  ;;  %v1037_v38 = vor.u32 %v1253_v32, %v1036_v31  ;;  %v966_v39 = vld [vmem:[#allocation7 + $0x48] sm:$0xf0]  ;;  %v1028_v42 = vld [vmem:[#allocation7 + $0xc0] sm:$0xf]  ;;  %v965_v44 = vor.u32 %v1235_v36, %v964_v35 }
  0x3a   : > { %v1250_v40 = vld [vmem:[#allocation7 + $0xc4] sm:$0xf]  ;;  %v1030_v41 = vld [vmem:[#allocation7 + $0xc8] sm:$0xf0]  ;;  %v1251_v43 = vld [vmem:[#allocation7 + $0xc4] sm:$0xf0]  ;;  %v969_v45 = vor.u32 %v1234_v37, %v966_v39 }
  0x3b   : > { %502 = vmatpush.bf16.msra.mxu0 %v973_v29  ;;  %v1033_v46 = vor.u32 %v1250_v40, %v1030_v41  ;;  %v956_v47 = vld [vmem:[#allocation7 + $0x30] sm:$0xf]  ;;  %v1233_v48 = vld [vmem:[#allocation7 + $0x34] sm:$0xf0]  ;;  %v1232_v49 = vld [vmem:[#allocation7 + $0x34] sm:$0xf]  ;;  %v1029_v50 = vor.u32 %v1251_v43, %v1028_v42 }
  0x3c   : > { %528 = vmatpush.bf16.msra.mxu2 %v977_v33  ;;  %v958_v51 = vld [vmem:[#allocation7 + $0x38] sm:$0xf0]  ;;  %v1248_v52 = vld [vmem:[#allocation7 + $0xb4] sm:$0xf]  ;;  %v1020_v54 = vld [vmem:[#allocation7 + $0xb0] sm:$0xf]  ;;  %v957_v56 = vor.u32 %v1233_v48, %v956_v47 }
  0x3d   : > { %541 = vmatpush.bf16.msra.mxu3 %v1041_v34  ;;  %515 = vmatpush.bf16.msra.mxu1 %v1037_v38  ;;  %v1022_v53 = vld [vmem:[#allocation7 + $0xb8] sm:$0xf0]  ;;  %v1249_v55 = vld [vmem:[#allocation7 + $0xb4] sm:$0xf0]  ;;  %v961_v57 = vor.u32 %v1232_v49, %v958_v51  ;;  %v948_v59 = vld [vmem:[#allocation7 + $0x20] sm:$0xf] }
  0x3e   : > { %v1025_v58 = vor.u32 %v1248_v52, %v1022_v53  ;;  %v1231_v60 = vld [vmem:[#allocation7 + $0x24] sm:$0xf0]  ;;  %v1230_v61 = vld [vmem:[#allocation7 + $0x24] sm:$0xf]  ;;  %v1021_v62 = vor.u32 %v1249_v55, %v1020_v54  ;;  %v950_v63 = vld [vmem:[#allocation7 + $0x28] sm:$0xf0] }
  0x3f   : > { %503 = vmatpush.bf16.msra.mxu0 %v965_v44  ;;  %v1246_v0 = vld [vmem:[#allocation7 + $0xa4] sm:$0xf]  ;;  %v1014_v1 = vld [vmem:[#allocation7 + $0xa8] sm:$0xf0]  ;;  %v1012_v2 = vld [vmem:[#allocation7 + $0xa0] sm:$0xf]  ;;  %v949_v4 = vor.u32 %v1231_v60, %v948_v59  ;;  %v953_v5 = vor.u32 %v1230_v61, %v950_v63 }
  0x40   : > { %529 = vmatpush.bf16.msra.mxu2 %v969_v45  ;;  %v1247_v3 = vld [vmem:[#allocation7 + $0xa4] sm:$0xf0]  ;;  %v1017_v6 = vor.u32 %v1246_v0, %v1014_v1  ;;  %v940_v7 = vld [vmem:[#allocation7 + $0x10] sm:$0xf]  ;;  %v1229_v8 = vld [vmem:[#allocation7 + $0x14] sm:$0xf0] }
  0x41   : > { %542 = vmatpush.bf16.msra.mxu3 %v1033_v46  ;;  %516 = vmatpush.bf16.msra.mxu1 %v1029_v50  ;;  %v1228_v9 = vld [vmem:[#allocation7 + $0x14] sm:$0xf]  ;;  %v1013_v10 = vor.u32 %v1247_v3, %v1012_v2  ;;  %v942_v11 = vld [vmem:[#allocation7 + $0x18] sm:$0xf0]  ;;  %v1004_v14 = vld [vmem:[#allocation7 + $0x90] sm:$0xf]  ;;  %v941_v17 = vor.u32 %v1229_v8, %v940_v7 }
  0x42   : > { %v1244_v12 = vld [vmem:[#allocation7 + $0x94] sm:$0xf]  ;;  %v1006_v13 = vld [vmem:[#allocation7 + $0x98] sm:$0xf0]  ;;  %v1245_v15 = vld [vmem:[#allocation7 + $0x94] sm:$0xf0]  ;;  %v945_v21 = vor.u32 %v1228_v9, %v942_v11 }
  0x43   : > { %504 = vmatpush.bf16.msra.mxu0 %v957_v56  ;;  %v932_v16 = vld [vmem:[#allocation7] sm:$0xf]  ;;  %v1227_v18 = vld [vmem:[#allocation7 + $0x4] sm:$0xf0]  ;;  %v1226_v19 = vld [vmem:[#allocation7 + $0x4] sm:$0xf]  ;;  %v1009_v22 = vor.u32 %v1244_v12, %v1006_v13  ;;  %v1005_v26 = vor.u32 %v1245_v15, %v1004_v14 }
  0x44   : > { %530 = vmatpush.bf16.msra.mxu2 %v961_v57  ;;  %v934_v20 = vld [vmem:[#allocation7 + $0x8] sm:$0xf0]  ;;  %v1242_v23 = vld [vmem:[#allocation7 + $0x84] sm:$0xf]  ;;  %v1116_v25 = vld [vmem:[#allocation5 + $0x70] sm:$0xf]  ;;  %v933_v33 = vor.u32 %v1227_v18, %v932_v16 }
  0x45   : > { %543 = vmatpush.bf16.msra.mxu3 %v1025_v58  ;;  %517 = vmatpush.bf16.msra.mxu1 %v1021_v62  ;;  %v998_v24 = vld [vmem:[#allocation7 + $0x88] sm:$0xf0]  ;;  %v1209_v27 = vld [vmem:[#allocation5 + $0x74] sm:$0xf0]  ;;  %v1208_v28 = vld [vmem:[#allocation5 + $0x74] sm:$0xf]  ;;  %v937_v36 = vor.u32 %v1226_v19, %v934_v20 }
  0x46   : > { %v1118_v29 = vld [vmem:[#allocation5 + $0x78] sm:$0xf0]  ;;  %v1224_v30 = vld [vmem:[#allocation5 + $0xf4] sm:$0xf]  ;;  %v996_v34 = vld [vmem:[#allocation7 + $0x80] sm:$0xf]  ;;  %v1001_v37 = vor.u32 %v1242_v23, %v998_v24  ;;  %v1117_v40 = vor.u32 %v1209_v27, %v1116_v25 }
  0x47   : > { %505 = vmatpush.bf16.msra.mxu0 %v949_v4  ;;  %v1182_v31 = vld [vmem:[#allocation5 + $0xf8] sm:$0xf0]  ;;  %v1243_v35 = vld [vmem:[#allocation7 + $0x84] sm:$0xf0]  ;;  %v1180_v38 = vld [vmem:[#allocation5 + $0xf0] sm:$0xf]  ;;  %v1121_v41 = vor.u32 %v1208_v28, %v1118_v29 }
  0x48   : > { %531 = vmatpush.bf16.msra.mxu2 %v953_v5  ;;  %v1643_v32 = vld [vmem:[%s1632_s23] sm:$0xff]  ;;  %v1108_v42 = vld [vmem:[#allocation5 + $0x60] sm:$0xf]  ;;  %v1185_v43 = vor.u32 %v1224_v30, %v1182_v31  ;;  %v997_v44 = vor.u32 %v1243_v35, %v996_v34  ;;  %v1207_v45 = vld [vmem:[#allocation5 + $0x64] sm:$0xf0]  ;;  %vm229_vm0 = vcmask 1043456  }
  0x49   : > { %544 = vmatpush.bf16.msra.mxu3 %v1017_v6  ;;  %518 = vmatpush.bf16.msra.mxu1 %v1013_v10  ;;  %224 = vst [vmem:[#allocation1] ss:$2 sm:$0xff] %v1643_v32  ;;  %v1225_v39 = vld [vmem:[#allocation5 + $0xf4] sm:$0xf0]  ;;  %v1206_v46 = vld [vmem:[#allocation5 + $0x64] sm:$0xf]  ;;  %v1109_v54 = vor.u32 %v1207_v45, %v1108_v42 }
  0x4a   : > { %v1110_v47 = vld [vmem:[#allocation5 + $0x68] sm:$0xf0]  ;;  %v1181_v48 = vor.u32 %v1225_v39, %v1180_v38  ;;  %v1222_v49 = vld [vmem:[#allocation5 + $0xe4] sm:$0xf]  ;;  %v1172_v51 = vld [vmem:[#allocation5 + $0xe0] sm:$0xf] }
  0x4b   : > { %506 = vmatpush.bf16.msra.mxu0 %v941_v17  ;;  %v1174_v50 = vld [vmem:[#allocation5 + $0xe8] sm:$0xf0]  ;;  %v1223_v52 = vld [vmem:[#allocation5 + $0xe4] sm:$0xf0]  ;;  %v1100_v53 = vld [vmem:[#allocation5 + $0x50] sm:$0xf]  ;;  %v1113_v55 = vor.u32 %v1206_v46, %v1110_v47 }
  0x4c   : > { %532 = vmatpush.bf16.msra.mxu2 %v945_v21  ;;  %v1205_v56 = vld [vmem:[#allocation5 + $0x54] sm:$0xf0]  ;;  %v1204_v57 = vld [vmem:[#allocation5 + $0x54] sm:$0xf]  ;;  %v1102_v58 = vld [vmem:[#allocation5 + $0x58] sm:$0xf0]  ;;  %v1177_v59 = vor.u32 %v1222_v49, %v1174_v50  ;;  %v1173_v62 = vor.u32 %v1223_v52, %v1172_v51 }
  0x4d   : > { %545 = vmatpush.bf16.msra.mxu3 %v1009_v22  ;;  %519 = vmatpush.bf16.msra.mxu1 %v1005_v26  ;;  %v1220_v63 = vld [vmem:[#allocation5 + $0xd4] sm:$0xf]  ;;  %v1166_v0 = vld [vmem:[#allocation5 + $0xd8] sm:$0xf0]  ;;  %v1164_v1 = vld [vmem:[#allocation5 + $0xd0] sm:$0xf]  ;;  %v1101_v3 = vor.u32 %v1205_v56, %v1100_v53  ;;  %v1105_v4 = vor.u32 %v1204_v57, %v1102_v58 }
  0x4e   : > { %v1221_v2 = vld [vmem:[#allocation5 + $0xd4] sm:$0xf0]  ;;  %v1092_v5 = vld [vmem:[#allocation5 + $0x40] sm:$0xf]  ;;  %v1169_v6 = vor.u32 %v1220_v63, %v1166_v0  ;;  %v1203_v7 = vld [vmem:[#allocation5 + $0x44] sm:$0xf0] }
  0x4f   : > { %507 = vmatpush.bf16.msra.mxu0 %v933_v33  ;;  %v1202_v8 = vld [vmem:[#allocation5 + $0x44] sm:$0xf]  ;;  %v1094_v9 = vld [vmem:[#allocation5 + $0x48] sm:$0xf0]  ;;  %v1165_v10 = vor.u32 %v1221_v2, %v1164_v1  ;;  %v1156_v13 = vld [vmem:[#allocation5 + $0xc0] sm:$0xf]  ;;  %v1093_v17 = vor.u32 %v1203_v7, %v1092_v5 }
  0x50   : > { %533 = vmatpush.bf16.msra.mxu2 %v937_v36  ;;  %v225_v60 = vld.sshfl [vmem:[#allocation1] sm:$0xff pattern:$0x75316420]  ;;  %v1646_v61 = vld.sshfl [vmem:[#allocation1 + $0x8] sm:$0xff pattern:$0x75316420]  ;;  %v1097_v18 = vor.u32 %v1202_v8, %v1094_v9 }
  0x51   : > { %546 = vmatpush.bf16.msra.mxu3 %v1001_v37  ;;  %520 = vmatpush.bf16.msra.mxu1 %v997_v44  ;;  %253 = vst [vmem:[#allocation1] ss:$2 sm:$0xff] %v1643_v32  ;;  %v1218_v11 = vld [vmem:[#allocation5 + $0xc4] sm:$0xf]  ;;  %v1158_v12 = vld [vmem:[#allocation5 + $0xc8] sm:$0xf0] }
  0x52   : > { %v1219_v14 = vld [vmem:[#allocation5 + $0xc4] sm:$0xf0]  ;;  %v1084_v15 = vld [vmem:[#allocation5 + $0x30] sm:$0xf]  ;;  %v1201_v16 = vld [vmem:[#allocation5 + $0x34] sm:$0xf0]  ;;  %v1161_v24 = vor.u32 %v1218_v11, %v1158_v12 }
  0x53   : > { %712 = vmatpush.bf16.msrb.mxu0 %v1117_v40  ;;  %v1200_v19 = vld [vmem:[#allocation5 + $0x34] sm:$0xf]  ;;  %v1086_v20 = vld [vmem:[#allocation5 + $0x38] sm:$0xf0]  ;;  %v1157_v27 = vor.u32 %v1219_v14, %v1156_v13  ;;  %v1148_v29 = vld [vmem:[#allocation5 + $0xb0] sm:$0xf]  ;;  %v1085_v35 = vor.u32 %v1201_v16, %v1084_v15 }
  0x54   : > { %738 = vmatpush.bf16.msrb.mxu2 %v1121_v41  ;;  %v1216_v21 = vld [vmem:[#allocation5 + $0xb4] sm:$0xf]  ;;  %v1150_v28 = vld [vmem:[#allocation5 + $0xb8] sm:$0xf0]  ;;  %v1217_v33 = vld [vmem:[#allocation5 + $0xb4] sm:$0xf0]  ;;  %v1089_v36 = vor.u32 %v1200_v19, %v1086_v20 }
  0x55   : > { %751 = vmatpush.bf16.msrb.mxu3 %v1185_v43  ;;  %725 = vmatpush.bf16.msrb.mxu1 %v1181_v48  ;;  %v1076_v34 = vld [vmem:[#allocation5 + $0x20] sm:$0xf]  ;;  %v1199_v37 = vld [vmem:[#allocation5 + $0x24] sm:$0xf0]  ;;  %v1198_v38 = vld [vmem:[#allocation5 + $0x24] sm:$0xf]  ;;  %v1153_v42 = vor.u32 %v1216_v21, %v1150_v28  ;;  %v1149_v46 = vor.u32 %v1217_v33, %v1148_v29 }
  0x56   : > { %v1078_v39 = vld [vmem:[#allocation5 + $0x28] sm:$0xf0]  ;;  %v1214_v43 = vld [vmem:[#allocation5 + $0xa4] sm:$0xf]  ;;  %v230_v45 = vsel %vm229_vm0, %v225_v60, 0.0  ;;  %v237_v49 = vsel %vm229_vm0, %v1646_v61, 0.0 }
  0x57   : > { %713 = vmatpush.bf16.msrb.mxu0 %v1109_v54  ;;  %v1142_v44 = vld [vmem:[#allocation5 + $0xa8] sm:$0xf0]  ;;  %v1140_v47 = vld [vmem:[#allocation5 + $0xa0] sm:$0xf]  ;;  %v231_v48 = vrot.slane %v230_v45, 4  ;;  %v1505_v53 = vmov 4.0   ;;  %v1081_v56 = vor.u32 %v1198_v38, %v1078_v39 }
  0x58   : > { %739 = vmatpush.bf16.msrb.mxu2 %v1113_v55  ;;  %v254_v22 = vld.sshfl [vmem:[#allocation1] sm:$0xff pattern:$0x75316420]  ;;  %v255_v23 = vld.sshfl [vmem:[#allocation1 + $0x8] sm:$0xff pattern:$0x75316420]  ;;  %1329 = vrcp.f32 %v1505_v53  ;;  %v1077_v55 = vor.u32 %v1199_v37, %v1076_v34 }
  0x59   : > { %752 = vmatpush.bf16.msrb.mxu3 %v1177_v59  ;;  %726 = vmatpush.bf16.msrb.mxu1 %v1173_v62  ;;  %v258_v25 = vsel %vm229_vm0, %v254_v22, -inf  ;;  %v265_v26 = vsel %vm229_vm0, %v255_v23, -inf  ;;  %v1215_v52 = vld [vmem:[#allocation5 + $0xa4] sm:$0xf0]  ;;  %v238_v54 = vrot.slane %v237_v49, 4  ;;  %v232_v58 = vadd.f32 %v231_v48, %v230_v45  ;;  %s1258_s20 = sshll.u32 %s1550_s19, 3 }
  0x5a   : > { %v259_v30 = vrot.slane %v258_v25, 4  ;;  %v266_v31 = vrot.slane %v265_v26, 4  ;;  %v1068_v57 = vld [vmem:[#allocation5 + $0x10] sm:$0xf]  ;;  %v1145_v62 = vor.u32 %v1214_v43, %v1142_v44  ;;  %v1197_v63 = vld [vmem:[#allocation5 + $0x14] sm:$0xf0]  ;;  %v1141_v2 = vor.u32 %v1215_v52, %v1140_v47  ;;  %s823_s25 = scalar_lea.hbm %s1694_s3, %s1258_s20 }
  0x5b   : > { %714 = vmatpush.bf16.msrb.mxu0 %v1101_v3  ;;  %v1196_v0 = vld [vmem:[#allocation5 + $0x14] sm:$0xf]  ;;  %v1070_v1 = vld [vmem:[#allocation5 + $0x18] sm:$0xf0]  ;;  %v239_v61 = vadd.f32 %v238_v54, %v237_v49  ;;  %v1069_v9 = vor.u32 %v1197_v63, %v1068_v57  ;;  %v1132_v11 = vld [vmem:[#allocation5 + $0x90] sm:$0xf] }
  0x5c   : > { %740 = vmatpush.bf16.msrb.mxu2 %v1105_v4  ;;  %v260_v40 = vmax.f32 %v258_v25, %v259_v30  ;;  %v267_v41 = vmax.f32 %v265_v26, %v266_v31  ;;  %v1212_v3 = vld [vmem:[#allocation5 + $0x94] sm:$0xf]  ;;  %v233_v4 = vrot.slane %v232_v58, 2  ;;  %v1134_v7 = vld [vmem:[#allocation5 + $0x98] sm:$0xf0]  ;;  %s221_s26 = scalar_lea.vmem [#allocation8], %s926_s21 }
  0x5d   : > { %753 = vmatpush.bf16.msrb.mxu3 %v1169_v6  ;;  %727 = vmatpush.bf16.msrb.mxu1 %v1165_v10  ;;  %v240_v8 = vrot.slane %v239_v61, 2  ;;  %v1073_v10 = vor.u32 %v1196_v0, %v1070_v1  ;;  %v1213_v12 = vld [vmem:[#allocation5 + $0x94] sm:$0xf0]  ;;  %v1060_v13 = vld [vmem:[#allocation5] sm:$0xf]  ;;  %v1137_v25 = vor.u32 %v1212_v3, %v1134_v7  ;;  %s825_s19 = sshll.u32 %s221_s26, 4  ;;  %s826_s19 = int_to_ptr.vmem [resolvable:$true] %s825_s19 }
  0x5e   : > { %v261_v50 = vrot.slane %v260_v40, 2  ;;  %v268_v51 = vrot.slane %v267_v41, 2  ;;  %v1330_v14 = vpop.eup %1329  ;;  %v1062_v19 = vld [vmem:[#allocation5 + $0x8] sm:$0xf0]  ;;  %v234_v20 = vadd.f32 %v233_v4, %v232_v58  ;;  %v1133_v26 = vor.u32 %v1213_v12, %v1132_v11  ;;  %v1124_v31 = vld [vmem:[#allocation5 + $0x80] sm:$0xf] }
  0x5f   : > { %715 = vmatpush.bf16.msrb.mxu0 %v1093_v17  ;;  %v1195_v17 = vld [vmem:[#allocation5 + $0x4] sm:$0xf0]  ;;  %v241_v21 = vadd.f32 %v240_v8, %v239_v61  ;;  %v245_v22 = vmul.f32 4.0, %v1330_v14  ;;  %v1126_v28 = vld [vmem:[#allocation5 + $0x88] sm:$0xf0]  ;;  %vm249_vm1 = vweird.f32 %v1330_v14  ;;  %s827_s27 = sshll.u32 %s823_s25, 4  ;;  %s828_s27 = int_to_ptr.hbm [resolvable:$true] %s827_s27 }
  0x60   : > { %741 = vmatpush.bf16.msrb.mxu2 %v1097_v18  ;;  %v262_v59 = vmax.f32 %v260_v40, %v261_v50  ;;  %v269_v60 = vmax.f32 %v267_v41, %v268_v51  ;;  %v1194_v18 = vld [vmem:[#allocation5 + $0x4] sm:$0xf]  ;;  %v1061_v29 = vor.u32 %v1195_v17, %v1060_v13  ;;  %v1211_v33 = vld [vmem:[#allocation5 + $0x84] sm:$0xf0]  ;;  %s812_s28 = scalar_lea.sflag [#allocation4], %s1626_s10  ;;  %s1443_s29 = sshra.s32 %s828_s27, 4  ;;  %s1444_s29 = int_to_ptr.hbm [resolvable:$true] %s1443_s29 }
  0x61   : > { %754 = vmatpush.bf16.msrb.mxu3 %v1161_v24  ;;  %728 = vmatpush.bf16.msrb.mxu1 %v1157_v27  ;;  %v1210_v27 = vld [vmem:[#allocation5 + $0x84] sm:$0xf]  ;;  %v1065_v30 = vor.u32 %v1194_v18, %v1062_v19  ;;  %v246_v34 = vsub.f32 1.0, %v245_v22  ;;  %v1125_v39 = vor.u32 %v1211_v33, %v1124_v31  ;;  %s1445_s30 = scalar_lea.hbm %s1444_s29, 8  ;;  %s1449_s17 = scalar_lea.hbm %s1694_s3, 16 }
  0x62   : > { %v263_v5 = vrot.slane %v262_v59, 1  ;;  %v270_v6 = vrot.slane %v269_v60, 1  ;;  %v1129_v38 = vor.u32 %v1210_v27, %v1126_v28  ;;  %p1446_p1 = scmp.ne.s32.totalorder %s1444_s29, %s1445_s30  ;;  %p1450_p12 = scmp.lt.s32.totalorder %s1444_s29, %s1694_s3 }
  0x63   : > { %716 = vmatpush.bf16.msrb.mxu0 %v1085_v35  ;;  %v235_v35 = vrot.slane %v234_v20, 1  ;;  %v247_v37 = vmul.f32 %v1330_v14, %v246_v34  ;;  %p1451_p7 = scmp.lt.s32.totalorder %s1449_s17, %s1445_s30 }
  0x64   : > { %742 = vmatpush.bf16.msrb.mxu2 %v1089_v36  ;;  %v264_v15 = vmax.f32 %v262_v59, %v263_v5  ;;  %v271_v16 = vmax.f32 %v269_v60, %v270_v6  ;;  %v242_v36 = vrot.slane %v241_v21, 1  ;;  %p1447_p3 = pnand %p1446_p1, %p1595_p4 }
  0x65   : > { %755 = vmatpush.bf16.msrb.mxu3 %v1153_v42  ;;  %729 = vmatpush.bf16.msrb.mxu1 %v1149_v46  ;;  %v248_v40 = vadd.f32 %v1330_v14, %v247_v37  ;;  %v236_v41 = vadd.f32 %v235_v35, %v234_v20  ;;  %p1452_p8 = por %p1451_p7, %p1450_p12 }
  0x66   : > { %v306_v23 = vpack.c.bf16 %v264_v15, %v264_v15  ;;  %v307_v24 = vpack.c.bf16 %v271_v16, %v271_v16  ;;  %v243_v42 = vadd.f32 %v242_v36, %v241_v21  ;;  %p1448_p5 = pneg %p1447_p3 }
  0x67   : > { %717 = vmatpush.bf16.msrb.mxu0 %v1077_v55  ;;  %v250_v43 = vsel %vm249_vm1, %v1330_v14, %v248_v40 }
  0x68   : > { %743 = vmatpush.bf16.msrb.mxu2 %v1081_v56  ;;  %547 = vmatmul.bf16.vlgmr.msra.gmra.mxu3 %v307_v24  ;;  %v251_v44 = vmul.f32 %v250_v43, %v236_v41  ;;  %v252_v45 = vmul.f32 %v250_v43, %v243_v42  ;;  %p1453_p9 = pnand %p1452_p8, %p1448_p5 }
  0x69   : > { %756 = vmatpush.bf16.msrb.mxu3 %v1145_v62  ;;  %730 = vmatpush.bf16.msrb.mxu1 %v1141_v2 }
  0x6a   : > { %534 = vmatmul.bf16.vlgmr.msra.gmra.mxu2 %v306_v23  ;;  %508 = vmatmul.bf16.vlgmr.msra.gmra.mxu0 %v306_v23  ;;  %v272_v46 = vpack.c.bf16 %v251_v44, %v251_v44  ;;  %v273_v47 = vpack.c.bf16 %v252_v45, %v252_v45 }
  0x6b   : > { %718 = vmatpush.bf16.msrb.mxu0 %v1069_v9  ;;  %521 = vmatmul.bf16.vlgmr.msra.gmra.mxu1 %v307_v24 }
  0x6c   : > { %744 = vmatpush.bf16.msrb.mxu2 %v1073_v10 }
  0x6d   : > { %757 = vmatpush.bf16.msrb.mxu3 %v1137_v25  ;;  %731 = vmatpush.bf16.msrb.mxu1 %v1133_v26 }
  0x6f   : > { %719 = vmatpush.bf16.msrb.mxu0 %v1061_v29 }
  0x70   : > { %745 = vmatpush.bf16.msrb.mxu2 %v1065_v30 }
  0x71   : > { %758 = vmatpush.bf16.msrb.mxu3 %v1129_v38  ;;  %732 = vmatpush.bf16.msrb.mxu1 %v1125_v39 }
  0x78   : > { %759 = vmatmul.bf16.vlgmr.msrb.gmra.mxu3 %v273_v47 }
  0x7a   : > { %746 = vmatmul.bf16.vlgmr.msrb.gmra.mxu2 %v272_v46  ;;  %720 = vmatmul.bf16.vlgmr.msrb.gmra.mxu0 %v272_v46 }
  0x7b   : > { %733 = vmatmul.bf16.vlgmr.msrb.gmra.mxu1 %v273_v47 }
  0xe7   : > { %v509_v48 = vpop.f32.mrf.mxu0 }
  0xe8   : > { %v522_v49 = vpop.f32.mrf.mxu1 }
  0xe9   : > { %v523_v56 = vadd.f32 %v522_v49, %v509_v48 }
  0xeb   : > { %v548_v51 = vpop.f32.mrf.mxu3 }
  0xed   : > { %v535_v50 = vpop.f32.mrf.mxu2 }
  0xee   : > { %v549_v62 = vadd.f32 %v548_v51, %v535_v50 }
  0xef   : > { %v511_v52 = vpop.f32.mrf.mxu0 }
  0xf0   : > { %v524_v53 = vpop.f32.mrf.mxu1 }
  0xf3   : > { %v550_v55 = vpop.f32.mrf.mxu3 }
  0xf5   : > { %v537_v54 = vpop.f32.mrf.mxu2 }
  0xf7   : > { %v721_v57 = vpop.f32.mrf.mxu0 }
  0xf8   : > { %v734_v58 = vpop.f32.mrf.mxu1  ;;  %v722_v59 = vadd.f32 %v721_v57, %v523_v56 }
  0xfa   : > { %v735_v60 = vadd.f32 %v734_v58, %v722_v59 }
  0xfb   : > { %v760_v1 = vpop.f32.mrf.mxu3 }
  0xfc   : > { %v1186_v63 = vmul.f32 -1.442695, %v735_v60 }
  0xfd   : > { %v747_v0 = vpop.f32.mrf.mxu2 }
  0xfe   : > { %v748_v61 = vadd.f32 %v747_v0, %v549_v62  ;;  %1331 = vpow2.f32 %v1186_v63 }
  0xff   : > { %v723_v3 = vpop.f32.mrf.mxu0 }
 0x100   : > { %v761_v2 = vadd.f32 %v760_v1, %v748_v61  ;;  %v736_v4 = vpop.f32.mrf.mxu1 }
 0x102   : > { %v1187_v5 = vmul.f32 -1.442695, %v761_v2 }
 0x103   : > { %v762_v8 = vpop.f32.mrf.mxu3 }
 0x104   : > { %1333 = vpow2.f32 %v1187_v5  ;;  %v1332_v6 = vpop.eup %1331 }
 0x105   : > { %v749_v7 = vpop.f32.mrf.mxu2  ;;  %v770_v9 = vadd.f32 1.0, %v1332_v6 }
 0x107   : > { %1335 = vrcp.f32 %v770_v9  ;;  %vm777_vm3 = vweird.f32 %v770_v9  ;;  %v783_v20 = vand.u32 2147483648, %v770_v9  ;;  %v781_v22 = vand.u32 2147483647, %v770_v9 }
 0x109   : > { %v784_v27 = vor.u32 1.1754944e-38, %v783_v20  ;;  %vm782_vm8 = vcmp.eq.f32.partialorder %v781_v22, 8.507059e+37 }
 0x10a   : > { %v1334_v10 = vpop.eup %1333 }
 0x10b   : > { %v771_v11 = vadd.f32 1.0, %v1334_v10 }
 0x10d   : > { %1337 = vrcp.f32 %v771_v11  ;;  %v1336_v12 = vpop.eup %1335  ;;  %v798_v21 = vand.u32 2147483648, %v771_v11  ;;  %v796_v24 = vand.u32 2147483647, %v771_v11  ;;  %vm792_vm6 = vweird.f32 %v771_v11 }
 0x10e   : > { %v773_v13 = vmul.f32 %v1336_v12, %v770_v9  ;;  %vm778_vm2 = vweird.f32 %v1336_v12 }
 0x10f   : > { %vm779_vm5 = vmor %vm777_vm3, %vm778_vm2  ;;  %v799_v28 = vor.u32 1.1754944e-38, %v798_v21  ;;  %vm797_vm9 = vcmp.eq.f32.partialorder %v796_v24, 8.507059e+37 }
 0x110   : > { %v774_v14 = vsub.f32 1.0, %v773_v13 }
 0x112   : > { %v775_v16 = vmul.f32 %v1336_v12, %v774_v14 }
 0x113   : > { %v1338_v15 = vpop.eup %1337 }
 0x114   : > { %v788_v17 = vmul.f32 %v1338_v15, %v771_v11  ;;  %v776_v18 = vadd.f32 %v1336_v12, %v775_v16  ;;  %vm793_vm4 = vweird.f32 %v1338_v15 }
 0x115   : > { %vm794_vm7 = vmor %vm792_vm6, %vm793_vm4 }
 0x116   : > { %v789_v19 = vsub.f32 1.0, %v788_v17  ;;  %v780_v26 = vsel %vm779_vm5, %v1336_v12, %v776_v18 }
 0x117   : > { %v785_v30 = vsel %vm782_vm8, %v784_v27, %v780_v26 }
 0x118   : > { %v790_v23 = vmul.f32 %v1338_v15, %v789_v19  ;;  %v802_v34 = vperm.slane %v785_v30, 0 }
 0x11a   : > { %v791_v25 = vadd.f32 %v1338_v15, %v790_v23 }
 0x11c   : > { %v795_v29 = vsel %vm794_vm7, %v1338_v15, %v791_v25 }
 0x11d   : > { %v800_v31 = vsel %vm797_vm9, %v799_v28, %v795_v29 }
 0x11e   : > { %v803_v33 = vperm.slane %v800_v31, 0 }
 0x120   : > { %v806_v35 = vrot.slane %v803_v33, 4 }
 0x122   : > { %v807_v36 = vsel %vm229_vm0, %v802_v34, %v806_v35 }
 0x123   : > { %v809_v37 = vmul.f32 %v807_v36, %v1643_v32 }
 0x125   : > { %810 = vst [vmem:[%s221_s26] sm:$0xff] %v809_v37 }
 0x126   : > { %1456 = shalt.err (!%p1453_p9)
}
 0x127   : > { %1269 = dma.vmem_to_hbm [thread:$0]  (%p1595_p4), %s826_s19, 128, %s828_s27, %s812_s28  }
 0x128 PF: > { %s839_s10 = sand.u32 1, %s1487_s12   ;;  %p1701_p10 = scmp.ge.s32.totalorder %s1499_s15, 2 }
 0x129   : > { %s840_s21 = scalar_lea.sflag [#allocation4], %s839_s10 }
 0x12a   : > { %p1283_p13 = pnand %p1701_p10, %p1599_p6 }
 0x12c   : > { %p1284_p11 = pneg %p1283_p13 }
 0x12e   : > { %1482 = dma.done.wait (%p1284_p11), %s840_s21, 128  }
 0x12f   : > { %1484 = vsyncadd (%p1284_p11), %s840_s21, 4294967168  ;;  %p17_p0 = scmp.ge.s32.totalorder %s1569_s4, 4   ;;  %s1702_s12 = smov %s1491_s13 }
 0x130   : > { %s1703_s13 = smov %s1495_s14  ;;  %s1704_s14 = smov %s1580_s7 }
 0x131   : > { %s1705_s15 = smov %s1569_s4  ;;  %19 = sbr.rel (!%p17_p0) target bundleno = 6 (0x6), region = 85 }
 0x136   :  { %846 = vsyncpa [#allocation3], 1 }
 0x137   :  { %848 = vsyncpa [#allocation3 + $0x1], 1 }
 0x138   :  { %849 = vsyncpa [#allocation6], 1 }
 0x139   :  { %850 = vsyncpa [#allocation4], 1 }
 0x13a   :  { %852 = vsyncpa [#allocation4 + $0x1], 1 }

</bundles_post_ra>
